<compile_context>
chip_gen: v5e
topology: v5e:2x2
jax: 0.10.0
libtpu: 0.0.40
codegen_flags: <defaults>
</compile_context>

<pallas_src>
import math

import jax
import jax.numpy as jnp
from jax.experimental import pallas as pl
from jax.experimental.pallas import tpu as pltpu


# --------------------------------------------------------------------------------------
# Kernel: one (1, TP, TQ) input block -> one (1, TQ, TP) output block.
# --------------------------------------------------------------------------------------
def _transpose_kernel(x_ref, o_ref):
    # x_ref block: (1, TP, TQ); o_ref block: (1, TQ, TP).
    o_ref[0] = x_ref[0].T  # 2-D block transpose -> XLU


def _pick_tile(n, target=512, multiple=128):
    """Full dim if it is small enough, else the largest multiple of 128 <= target."""
    if n <= target:
        return n
    return max(multiple, (target // multiple) * multiple)


def _transpose_last_two(x3, tp, tq):
    """[B, P, Q] -> [B, Q, P] via a tiled Pallas kernel."""
    B, P, Q = x3.shape
    grid = (B, pl.cdiv(P, tp), pl.cdiv(Q, tq))
    return pl.pallas_call(
        _transpose_kernel,
        out_shape=jax.ShapeDtypeStruct((B, Q, P), x3.dtype),
        grid_spec=pltpu.PrefetchScalarGridSpec(
            num_scalar_prefetch=0,
            grid=grid,
            in_specs=[pl.BlockSpec((1, tp, tq), lambda b, i, j: (b, i, j))],
            out_specs=pl.BlockSpec((1, tq, tp), lambda b, i, j: (b, j, i)),
        ),
        compiler_params=pltpu.CompilerParams(
            dimension_semantics=("parallel", "parallel", "parallel")),
    )(x3)


# --------------------------------------------------------------------------------------
# Wrapper mirroring `_Transpose.forward`.
# --------------------------------------------------------------------------------------
def pallas_transpose(x, dims, tile_p=None, tile_q=None):
    """Equivalent of torch `x.transpose(*dims)` for a 2-tuple of dims."""
    assert len(dims) == 2, "dims must be a tuple of two dimensions"
    nd = x.ndim
    d0, d1 = dims[0] % nd, dims[1] % nd
    if d0 == d1:
        return x
    d0, d1 = min(d0, d1), max(d0, d1)

    if (d0, d1) == (nd - 2, nd - 1):
        # Trailing-two-axes transpose (the pcmer.py `_Transpose((1, 2))` use case).
        lead = x.shape[: nd - 2]
        P, Q = x.shape[-2], x.shape[-1]
        B = math.prod(lead) if lead else 1
        x3 = x.reshape(B, P, Q)
        tp = tile_p if tile_p is not None else _pick_tile(P)
        tq = tile_q if tile_q is not None else _pick_tile(Q)
        y3 = _transpose_last_two(x3, tp, tq)
        return y3.reshape(*lead, Q, P)

    # TODO(synk): transposes whose swapped axes are not the trailing pair (unused by
    # pcmer.py) have no dedicated Pallas kernel here; fall back to XLA's transpose.
    return jnp.swapaxes(x, d0, d1)


class Transpose:
    """Mirrors ddsp/pcmer.py `_Transpose`: forward(x) = x.transpose(*dims)."""

    def __init__(self, dims):
        assert len(dims) == 2, "dims must be a tuple of two dimensions"
        self.dims = tuple(dims)

    def __call__(self, x, tile_p=None, tile_q=None):
        return pallas_transpose(x, self.dims, tile_p=tile_p, tile_q=tile_q)


# --------------------------------------------------------------------------------------
# Self-test.
# --------------------------------------------------------------------------------------
if __name__ == "__main__":
    key = jax.random.PRNGKey(0)
    k1, k2 = jax.random.split(key)

    # pcmer.py usage: _Transpose((1, 2)) on [batch, seq, channels].
    x = jax.random.normal(k1, (2, 16, 32), jnp.float32)
    tr = Transpose((1, 2))
    y = jax.block_until_ready(tr(x))
    assert y.shape == (2, 32, 16)
    assert jnp.array_equal(y, jnp.swapaxes(x, 1, 2)), "mismatch vs reference (small)"

    # Larger case exercising the tiled, lane-dense (128x128 block) path.
    xb = jax.random.normal(k2, (2, 256, 384), jnp.float32)
    yb = jax.block_until_ready(
        pallas_transpose(xb, (-2, -1), tile_p=128, tile_q=128))
    assert yb.shape == (2, 384, 256)
    assert jnp.array_equal(yb, jnp.swapaxes(xb, -2, -1)), "mismatch vs reference (tiled)"

    print("KERNEL_OK")
</pallas_src>

<mosaic_0001>
module attributes {stable_mosaic.version = 11 : i64} {
  func.func @_transpose_kernel(%arg0: i32, %arg1: i32, %arg2: i32, %arg3: memref<1x16x32xf32, #tpu.memory_space<vmem>>, %arg4: memref<1x32x16xf32, #tpu.memory_space<vmem>>) attributes {dimension_semantics = [#tpu.dimension_semantics<parallel>, #tpu.dimension_semantics<parallel>, #tpu.dimension_semantics<parallel>], iteration_bounds = array<i64: 2, 1, 1>, scalar_prefetch = 0 : i64, scratch_operands = 0 : i64, tpu.core_type = #tpu.core_type<tc>, window_params = [{transform_indices = @transform_0, window_bounds = array<i64: 1, 16, 32>}, {transform_indices = @transform_1, window_bounds = array<i64: 1, 32, 16>}]} {
    %c0 = arith.constant 0 : index
    %c0_0 = arith.constant 0 : index
    %c0_1 = arith.constant 0 : index
    %0 = vector.load %arg3[%c0, %c0_0, %c0_1] : memref<1x16x32xf32, #tpu.memory_space<vmem>>, vector<1x16x32xf32>
    %1 = vector.shape_cast %0 : vector<1x16x32xf32> to vector<16x32xf32>
    %2 = tpu.transpose %1, [1, 0] : vector<16x32xf32> -> vector<32x16xf32>
    %c0_2 = arith.constant 0 : index
    %c0_3 = arith.constant 0 : index
    %c0_4 = arith.constant 0 : index
    %3 = vector.load %arg4[%c0_2, %c0_3, %c0_4] : memref<1x32x16xf32, #tpu.memory_space<vmem>>, vector<1x32x16xf32>
    %4 = vector.shape_cast %3 : vector<1x32x16xf32> to vector<32x16xf32>
    %5 = vector.shape_cast %2 : vector<32x16xf32> to vector<1x32x16xf32>
    tpu.vector_store %arg4[%c0_2, %c0_3, %c0_4], %5 {strides = array<i32>} : memref<1x32x16xf32, #tpu.memory_space<vmem>>, vector<1x32x16xf32>,
    return
  }
  func.func @transform_0(%arg0: i32, %arg1: i32, %arg2: i32) -> (i32, i32, i32) {
    %c0_i32 = arith.constant 0 : i32
    return %arg0, %arg1, %arg2 : i32, i32, i32
  }
  func.func @transform_1(%arg0: i32, %arg1: i32, %arg2: i32) -> (i32, i32, i32) {
    %c0_i32 = arith.constant 0 : i32
    return %arg0, %arg2, %arg1 : i32, i32, i32
  }
}

</mosaic_0001>

<bundles_post_ra>
// kernel: tpu_custom_call.1
= control target key start
LH: loop header
LB: loop body
LE: loop exit
PB: predicated region body
PF: predicated region fallthrough
CT: control target
= control target key end

     0   :  { %6 = vsyncpa [#allocation3], 0  ;;  %s588_s0 = inlined_call_operand.hbm [shape: f32[2,16,32], index: 0, kind: input, shape index: {}]   ;;  %s589_s1 = inlined_call_operand.vmem [shape: f32[2,32,16], index: 1, kind: output, shape index: {}]  }
   0x1   :  { %8 = vsyncpa [#allocation3 + $0x1], 0  ;;  %s500_s6 = smov 0   ;;  %s502_s7 = smov 0  }
   0x2   :  { %s504_s8 = smov 0   ;;  %s506_s9 = smov 0  }
   0x3   :  { %s508_s10 = smov 0   ;;  %s510_s11 = smov 0  }
   0x4 LB: > { %s333_s12 = sadd.s32 4294967295, %s486_s11   ;;  %s33_s13 = sadd.s32 1, %s482_s10  ;;  %s486_s11 = sphi %s510_s11, %s14_s11   ;;  %s482_s10 = sphi %s508_s10, %s596_s10   ;;  %s478_s9 = sphi %s506_s9, %s595_s9   ;;  %s474_s8 = sphi %s504_s8, %s594_s8   ;;  %s470_s7 = sphi %s502_s7, %s593_s7   ;;  %s466_s6 = sphi %s500_s6, %s592_s6  }
   0x5   : > { %p35_p0 = scmp.ge.s32.totalorder %s33_s13, 2  ;;  %s44_s14 = sadd.s32 1, %s474_s8 }
   0x6   : > { %p51_p1 = scmp.ne.s32.totalorder %s474_s8, %s470_s7  ;;  %p52_p2 = scmp.eq.s32.totalorder %s486_s11, 0 }
   0x7   : > { %s598_s13 = smov (%p35_p0, %s33_s13), 0  ;;  %p57_p4 = scmp.ne.s32.totalorder %s470_s7, %s466_s6 }
   0x8   : > { %p536_p3 = por %p52_p2, %p51_p1  ;;  %s37_s16 = ssub.s32 %s482_s10, %s598_s13 }
   0x9   : > { %p58_p5 = scmp.eq.s32.totalorder %s333_s12, 0  ;;  %p42_p6 = scmp.eq.s32.totalorder %s37_s16, 0 }
   0xa   : > { %p354_p8 = scmp.lt.s32.totalorder %s486_s11, 2  ;;  %s111_s19 = sand.u32 1, %s474_s8  }
   0xb   : > { %p543_p7 = por %p58_p5, %p57_p4  ;;  %s346_s20 = sshll.u32 %s482_s10, 4 }
   0xc   : > { %s549_s18 = scalar_select %p42_p6, %s474_s8, %s44_s14  }
   0xd   : > { %s337_s21 = sshll.u32 %s111_s19, 4  ;;  %s123_s24 = scalar_lea.hbm %s588_s0, %s346_s20 }
   0xe   : > { %s124_s25 = sshll.u32 %s123_s24, 4  ;;  %s115_s26 = scalar_lea.vmem [#allocation2], %s337_s21  ;;  %s125_s25 = int_to_ptr.hbm [resolvable:$true] %s124_s25 }
   0xf   : > { %s126_s27 = sshll.u32 %s115_s26, 4  ;;  %p351_p9 = pnand %p354_p8, %p536_p3  ;;  %s127_s27 = int_to_ptr.vmem [resolvable:$true] %s126_s27 }
  0x10   : > { %p340_p10 = scmp.ge.s32.totalorder %s486_s11, 1  ;;  %p134_p11 = scmp.lt.s32.totalorder %s486_s11, 3 }
  0x11   : > { %s112_s28 = scalar_lea.sflag [#allocation3], %s111_s19  ;;  %s488_s29 = smov 128  }
  0x12   : > { %s489_s30 = smov 8   ;;  %p135_p12 = pnand %p340_p10, %p134_p11 }
  0x13   : > { %353 = dma.hbm_to_vmem [thread:$0]  (!%p351_p9), %s125_s25, 256, %s127_s27, %s112_s28, %s488_s29, %s488_s29, %s489_s30  }
  0x14   : > { %138 = sbr.rel (%p135_p12) target bundleno = 217 (0xd9), region = 24  ;;  %s140_s2 = sand.u32 (!%p135_p12), 1, %s470_s7  }
  0x15   : > { %s341_s3 = sshll.u32 (!%p135_p12), %s140_s2, 4  ;;  %s141_s4 = scalar_lea.sflag (!%p135_p12), [#allocation3], %s140_s2 }
  0x16   : > { %s144_s5 = scalar_lea.vmem (!%p135_p12), [#allocation2], %s341_s3 }
  0x19   : > { %461 = dma.done.wait (%p543_p7), %s141_s4, 256  }
  0x1a   : > { %463 = vsyncadd (%p543_p7), %s141_s4, 4294967040  ;;  %v185_v0 = vld [vmem:[%s144_s5] sm:$0xff]  ;;  %v186_v1 = vld [vmem:[%s144_s5 + $0x8] sm:$0xff]  ;;  %p173_p13 = scmp.lt.s32.totalorder %s478_s9, 1  ;;  %vm219_vm0 = vcmask 130048  }
  0x1b   : > { %187 = vxpose.xlu0.b32.start [1/2] (short) (narrow) %v185_v0, 32 }
  0x1c   : > { %s600_s9 = smov (!%p173_p13, %s478_s9), 1 }
  0x1d   : > { %s347_s6 = sshll.u32 %s600_s9, 5 }
  0x1e   : > { %s183_s15 = scalar_lea.vmem %s589_s1, %s347_s6 }
  0x23   : > { %188 = vxpose.xlu0.b32.end [2/2] (short) (narrow) %v186_v1, 32 }
  0xbf   : > { %v203_v2 = vpop.trf.xlu0 }
  0xc0   : > { %220 = vst.msk [vmem:[%s183_s15] sm:$0xff] %vm219_vm0, %v203_v2 }
  0xc7   : > { %v204_v3 = vpop.trf.xlu0 }
  0xc8   : > { %221 = vst.msk [vmem:[%s183_s15 + $0x8] sm:$0xff] %vm219_vm0, %v204_v3 }
  0xcf   : > { %v205_v4 = vpop.trf.xlu0 }
  0xd0   : > { %222 = vst.msk [vmem:[%s183_s15 + $0x10] sm:$0xff] %vm219_vm0, %v205_v4 }
  0xd7   : > { %v206_v5 = vpop.trf.xlu0 }
  0xd8   : > { %223 = vst.msk [vmem:[%s183_s15 + $0x18] sm:$0xff] %vm219_vm0, %v206_v5 }
  0xd9 PF: > { %s14_s11 = sadd.s32 1, %s486_s11   ;;  %s592_s6 = smov %s470_s7 }
  0xda   : > { %p11_p0 = scmp.ge.s32.totalorder %s14_s11, 4   ;;  %s593_s7 = smov %s474_s8 }
  0xdb   : > { %s594_s8 = smov %s549_s18  ;;  %s595_s9 = smov %s482_s10 }
  0xdc   : > { %s596_s10 = smov %s598_s13  ;;  %13 = sbr.rel (!%p11_p0) target bundleno = 4 (0x4), region = 64 }
  0xe1   :  { %260 = vsyncpa [#allocation3], 1 }
  0xe2   :  { %262 = vsyncpa [#allocation3 + $0x1], 1 }

</bundles_post_ra>
